<compile_context>
chip_gen: v6e
topology: v6e:2x2x1
jax: 0.10.0
libtpu: 0.0.40
codegen_flags: <defaults>
</compile_context>

<pallas_src>
import functools
import jax
import jax.numpy as jnp
from jax.experimental import pallas as pl
from jax.experimental.pallas import tpu as pltpu

NUM_CLASSES_PACS = 7   # dataset='pacs'
Z_DIM = 32             # synthetic base feature dim (stands in for backbone fc.in_features)
C_MID = 32             # synthetic conv stem width
KSIZE = 3
CLS_PAD = 128          # lane-dense logits / eps / bias slab width


def _softplus(x):
    # numerically stable softplus: max(x,0) + log1p(exp(-|x|))
    return jnp.maximum(x, 0.0) + jnp.log1p(jnp.exp(-jnp.abs(x)))


def fedsr_kernel(x_ref, conv_w_ref, fc_w_ref, cls_w_ref, bias_ref, eps_ref,
                 logits_ref, feats_ref, *, block_b, hw):
    """Processes a block of `block_b` images per grid step."""
    k_pad = x_ref.shape[-1]

    bias = bias_ref[...]                              # [3, 128] f32
    conv_b = bias[0:1, :C_MID]                        # [1, C_MID]
    fc_b = bias[1:2, :2 * Z_DIM]                      # [1, 2*Z_DIM]
    cls_b = bias[2:3, :]                              # [1, CLS_PAD]

    # --- base conv stem: single MXU pass (K folded over all 9 taps) -----------
    xp = x_ref[...].reshape(block_b * hw, k_pad)      # bf16, lane-dense
    conv_out = jnp.dot(xp, conv_w_ref[...], preferred_element_type=jnp.float32)
    feats_ref[...] = jnp.maximum(conv_out + conv_b, 0.0)   # [B*hw, C_MID] f32, ReLU

    # --- global average pool over spatial positions, per image ----------------
    pooled = jnp.mean(feats_ref[...].reshape(block_b, hw, C_MID), axis=1)  # [B, C_MID]

    # --- fused base fc -> z_params = (mu | sigma_pre), split in-register -------
    z_params = jnp.dot(pooled.astype(jnp.bfloat16), fc_w_ref[...],
                       preferred_element_type=jnp.float32) + fc_b   # [B, 2*Z_DIM]
    z_mu = z_params[:, :Z_DIM]
    z_sigma = _softplus(z_params[:, Z_DIM:])

    # --- reparameterised sample (num_samples=1) --------------------------------
    eps = eps_ref[...][:, 0, :Z_DIM]                  # [B, Z_DIM]
    z = z_mu + z_sigma * eps

    # --- classifier into a lane-dense padded slab ------------------------------
    logits = jnp.dot(z.astype(jnp.bfloat16), cls_w_ref[...],
                     preferred_element_type=jnp.float32) + cls_b    # [B, CLS_PAD]
    logits_ref[...] = logits.reshape(block_b, 1, CLS_PAD)


def fedsr_forward(x, params, eps, block_b=None):
    """x: NCHW float32. Returns logits [N, NUM_CLASSES_PACS] (float32)."""
    N, cin, H, W = x.shape
    hw = H * W
    k_taps = KSIZE * KSIZE * cin
    k_pad = ((k_taps + 127) // 128) * 128             # lane-dense contraction dim

    if block_b is None:
        # keep >=2 grid blocks when N >= 2 so v7x's 2 TCs both get work
        block_b = max(1, min(8, N // 2))
    n_blocks = pl.cdiv(N, block_b)
    n_pad = n_blocks * block_b

    # --- layout glue (plain JAX): im2col -> lane-dense bf16 operand ------------
    x_nhwc = jnp.transpose(x, (0, 2, 3, 1))
    x_p = jnp.pad(x_nhwc, ((0, 0), (1, 1), (1, 1), (0, 0)))          # "same" conv pad
    patches = [x_p[:, dh:dh + H, dw:dw + W, :]
               for dh in range(KSIZE) for dw in range(KSIZE)]        # tap-major
    x_col = jnp.concatenate(patches, axis=-1).reshape(N, hw, k_taps)
    x_col = jnp.pad(x_col, ((0, n_pad - N), (0, 0), (0, k_pad - k_taps)))
    x_col = x_col.astype(jnp.bfloat16)                               # [n_pad, hw, k_pad]

    # conv weight [C_MID, cin, K, K] -> [k_pad, C_MID] (tap-major, cin-minor rows)
    conv_w = jnp.transpose(params['conv_w'], (2, 3, 1, 0)).reshape(k_taps, C_MID)
    conv_w = jnp.pad(conv_w, ((0, k_pad - k_taps), (0, 0))).astype(jnp.bfloat16)

    # fused base fc: cols 0..Z-1 = mu, Z..2Z-1 = sigma_pre; presented [in, out]
    fc_w = jnp.concatenate([params['fc_mu_w'], params['fc_sig_w']], axis=0)
    fc_w = fc_w.T.astype(jnp.bfloat16)                               # [C_MID, 2*Z_DIM]

    # classifier weight padded to a lane-dense 128-wide slab
    cls_w = jnp.zeros((Z_DIM, CLS_PAD), jnp.float32)
    cls_w = cls_w.at[:, :NUM_CLASSES_PACS].set(params['cls_w'].T).astype(jnp.bfloat16)

    # pack all biases into one [3, 128] f32 slab
    def _pad_row(v):
        return jnp.zeros((1, CLS_PAD), jnp.float32).at[0, :v.shape[0]].set(v)
    bias = jnp.concatenate(
        [_pad_row(params['conv_b']),
         _pad_row(jnp.concatenate([params['fc_mu_b'], params['fc_sig_b']])),
         _pad_row(params['cls_b'])], axis=0)                         # [3, CLS_PAD]

    # eps as a lane-dense per-image slab
    eps_pad = jnp.zeros((n_pad, 1, CLS_PAD), jnp.float32)
    eps_pad = eps_pad.at[:N, 0, :Z_DIM].set(eps.astype(jnp.float32))

    kernel = functools.partial(fedsr_kernel, block_b=block_b, hw=hw)

    out = pl.pallas_call(
        kernel,
        out_shape=jax.ShapeDtypeStruct((n_pad, 1, CLS_PAD), jnp.float32),
        grid=(n_blocks,),
        in_specs=[
            pl.BlockSpec((block_b, hw, k_pad), lambda b: (b, 0, 0)),   # im2col'd x
            pl.BlockSpec((k_pad, C_MID), lambda b: (0, 0)),            # conv_w
            pl.BlockSpec((C_MID, 2 * Z_DIM), lambda b: (0, 0)),        # fc_w
            pl.BlockSpec((Z_DIM, CLS_PAD), lambda b: (0, 0)),          # cls_w
            pl.BlockSpec((3, CLS_PAD), lambda b: (0, 0)),              # biases
            pl.BlockSpec((block_b, 1, CLS_PAD), lambda b: (b, 0, 0)),  # eps
        ],
        out_specs=pl.BlockSpec((block_b, 1, CLS_PAD), lambda b: (b, 0, 0)),
        scratch_shapes=[pltpu.VMEM((block_b * hw, C_MID), jnp.float32)],
        compiler_params=pltpu.CompilerParams(
            dimension_semantics=("parallel",),     # shards image blocks over v7x's 2 TCs
            vmem_limit_bytes=32 * 1024 * 1024,     # safe on v7x's 64 MiB, ample headroom
        ),
    )(x_col, conv_w, fc_w, cls_w, bias, eps_pad)

    return out[:N, 0, :NUM_CLASSES_PACS]


def ref_forward(x, params, eps):
    """Pure-JAX f32 reference of the same synthetic forward."""
    out = jax.lax.conv_general_dilated(
        x, params['conv_w'], window_strides=(1, 1), padding='SAME',
        dimension_numbers=('NCHW', 'OIHW', 'NCHW'))
    out = jnp.maximum(out + params['conv_b'][None, :, None, None], 0.0)
    pooled = out.mean(axis=(2, 3))                                   # [N, C_MID]
    w = jnp.concatenate([params['fc_mu_w'], params['fc_sig_w']], axis=0)
    b = jnp.concatenate([params['fc_mu_b'], params['fc_sig_b']])
    z_params = pooled @ w.T + b
    z_mu = z_params[:, :Z_DIM]
    z_sigma = jax.nn.softplus(z_params[:, Z_DIM:])
    z = z_mu + z_sigma * eps
    return z @ params['cls_w'].T + params['cls_b']


def init_params(key, cin):
    ks = jax.random.split(key, 8)
    return {
        # conv stem: [Cout, Cin, K, K] (PyTorch layout)
        'conv_w': 0.1 * jax.random.normal(ks[0], (C_MID, cin, KSIZE, KSIZE), jnp.float32),
        'conv_b': 0.1 * jax.random.normal(ks[1], (C_MID,), jnp.float32),
        # base fc -> 2*z_dim, split into mu / sigma halves ([out, in] layout)
        'fc_mu_w': 0.1 * jax.random.normal(ks[2], (Z_DIM, C_MID), jnp.float32),
        'fc_mu_b': 0.1 * jax.random.normal(ks[3], (Z_DIM,), jnp.float32),
        'fc_sig_w': 0.1 * jax.random.normal(ks[4], (Z_DIM, C_MID), jnp.float32),
        'fc_sig_b': 0.1 * jax.random.normal(ks[5], (Z_DIM,), jnp.float32),
        # classifier Linear(z_dim, 7)
        'cls_w': 0.1 * jax.random.normal(ks[6], (NUM_CLASSES_PACS, Z_DIM), jnp.float32),
        'cls_b': 0.1 * jax.random.normal(ks[7], (NUM_CLASSES_PACS,), jnp.float32),
        # FedSR regularization parameters (unused in forward, kept for parity)
        'r_mu': jnp.zeros((NUM_CLASSES_PACS, Z_DIM), jnp.float32),
        'r_sigma': jnp.ones((NUM_CLASSES_PACS, Z_DIM), jnp.float32),
        'C': jnp.ones((), jnp.float32),
    }


if __name__ == "__main__":
    key = jax.random.PRNGKey(0)
    k_x, k_p, k_eps = jax.random.split(key, 3)

    N, Cin, H, W = 2, 4, 16, 16
    x = jax.random.normal(k_x, (N, Cin, H, W), jnp.float32)       # NCHW
    params = init_params(k_p, Cin)
    eps = jax.random.normal(k_eps, (N, Z_DIM), jnp.float32)       # rsample noise

    logits = fedsr_forward(x, params, eps)
    logits = jax.block_until_ready(logits)
    assert logits.shape == (N, NUM_CLASSES_PACS)
    assert bool(jnp.all(jnp.isfinite(logits)))

    ref = ref_forward(x, params, eps)
    assert bool(jnp.allclose(logits, ref, rtol=5e-2, atol=5e-2)), (
        "max abs err %s" % jnp.max(jnp.abs(logits - ref)))

    print("KERNEL_OK")
</pallas_src>

<mosaic_0001>
module attributes {stable_mosaic.version = 11 : i64} {
  func.func @fedsr_kernel(%arg0: i32, %arg1: memref<1x256x128xbf16, #tpu.memory_space<vmem>>, %arg2: memref<128x32xbf16, #tpu.memory_space<vmem>>, %arg3: memref<32x64xbf16, #tpu.memory_space<vmem>>, %arg4: memref<32x128xbf16, #tpu.memory_space<vmem>>, %arg5: memref<3x128xf32, #tpu.memory_space<vmem>>, %arg6: memref<1x1x128xf32, #tpu.memory_space<vmem>>, %arg7: memref<1x1x128xf32, #tpu.memory_space<vmem>>, %arg8: memref<256x32xf32, #tpu.memory_space<vmem>>) attributes {dimension_semantics = [#tpu.dimension_semantics<parallel>], iteration_bounds = array<i64: 2>, scalar_prefetch = 0 : i64, scratch_operands = 1 : i64, tpu.core_type = #tpu.core_type<tc>, window_params = [{transform_indices = @transform_0, window_bounds = array<i64: 1, 256, 128>}, {pipeline_mode = #tpu.pipeline_mode<synchronous>, transform_indices = @transform_1, window_bounds = array<i64: 128, 32>}, {pipeline_mode = #tpu.pipeline_mode<synchronous>, transform_indices = @transform_2, window_bounds = array<i64: 32, 64>}, {pipeline_mode = #tpu.pipeline_mode<synchronous>, transform_indices = @transform_3, window_bounds = array<i64: 32, 128>}, {pipeline_mode = #tpu.pipeline_mode<synchronous>, transform_indices = @transform_4, window_bounds = array<i64: 3, 128>}, {transform_indices = @transform_5, window_bounds = array<i64: 1, 1, 128>}, {transform_indices = @transform_6, window_bounds = array<i64: 1, 1, 128>}]} {
    %c0 = arith.constant 0 : index
    %c0_0 = arith.constant 0 : index
    %0 = vector.load %arg5[%c0, %c0_0] : memref<3x128xf32, #tpu.memory_space<vmem>>, vector<3x128xf32>
    %1 = vector.extract_strided_slice %0 {offsets = [0, 0], sizes = [1, 32], strides = [1, 1]} : vector<3x128xf32> to vector<1x32xf32>
    %2 = vector.extract_strided_slice %0 {offsets = [1, 0], sizes = [1, 64], strides = [1, 1]} : vector<3x128xf32> to vector<1x64xf32>
    %3 = vector.extract_strided_slice %0 {offsets = [2, 0], sizes = [1, 128], strides = [1, 1]} : vector<3x128xf32> to vector<1x128xf32>
    %c0_1 = arith.constant 0 : index
    %c0_2 = arith.constant 0 : index
    %c0_3 = arith.constant 0 : index
    %4 = vector.load %arg1[%c0_1, %c0_2, %c0_3] : memref<1x256x128xbf16, #tpu.memory_space<vmem>>, vector<1x256x128xbf16>
    %5 = vector.shape_cast %4 : vector<1x256x128xbf16> to vector<256x128xbf16>
    %c0_4 = arith.constant 0 : index
    %c0_5 = arith.constant 0 : index
    %6 = vector.load %arg2[%c0_4, %c0_5] : memref<128x32xbf16, #tpu.memory_space<vmem>>, vector<128x32xbf16>
    %cst = arith.constant dense<0.000000e+00> : vector<256x32xf32>
    %7 = tpu.matmul %5, %6, %cst {dimension_numbers = #tpu.dot_dimension_numbers<[1], [0], [0], [1], [0, 0, 1, 1], [], []>} : vector<256x128xbf16>, vector<128x32xbf16>, vector<256x32xf32> -> vector<256x32xf32>
    %8 = vector.broadcast %1 : vector<1x32xf32> to vector<256x32xf32>
    %9 = arith.addf %7, %8 : vector<256x32xf32>
    %cst_6 = arith.constant 0.000000e+00 : f32
    %10 = vector.broadcast %cst_6 : f32 to vector<256x32xf32>
    %11 = arith.maximumf %9, %10 : vector<256x32xf32>
    %c0_7 = arith.constant 0 : index
    %c0_8 = arith.constant 0 : index
    %12 = vector.load %arg8[%c0_7, %c0_8] : memref<256x32xf32, #tpu.memory_space<vmem>>, vector<256x32xf32>
    tpu.vector_store %arg8[%c0_7, %c0_8], %11 {strides = array<i32>} : memref<256x32xf32, #tpu.memory_space<vmem>>, vector<256x32xf32>,
    %c0_9 = arith.constant 0 : index
    %c0_10 = arith.constant 0 : index
    %13 = vector.load %arg8[%c0_9, %c0_10] : memref<256x32xf32, #tpu.memory_space<vmem>>, vector<256x32xf32>
    %14 = vector.shape_cast %13 : vector<256x32xf32> to vector<1x256x32xf32>
    %cst_11 = arith.constant dense<0.000000e+00> : vector<1x32xf32>
    %15 = vector.multi_reduction <add>, %14, %cst_11 [1] : vector<1x256x32xf32> to vector<1x32xf32>
    %cst_12 = arith.constant 2.560000e+02 : f32
    %16 = vector.broadcast %cst_12 : f32 to vector<1x32xf32>
    %17 = arith.divf %15, %16 : vector<1x32xf32>
    %18 = arith.truncf %17 : vector<1x32xf32> to vector<1x32xbf16>
    %c0_13 = arith.constant 0 : index
    %c0_14 = arith.constant 0 : index
    %19 = vector.load %arg3[%c0_13, %c0_14] : memref<32x64xbf16, #tpu.memory_space<vmem>>, vector<32x64xbf16>
    %cst_15 = arith.constant dense<0.000000e+00> : vector<1x64xf32>
    %20 = tpu.matmul %18, %19, %cst_15 {dimension_numbers = #tpu.dot_dimension_numbers<[1], [0], [0], [1], [0, 0, 1, 1], [], []>} : vector<1x32xbf16>, vector<32x64xbf16>, vector<1x64xf32> -> vector<1x64xf32>
    %21 = arith.addf %20, %2 : vector<1x64xf32>
    %22 = vector.extract_strided_slice %21 {offsets = [0, 0], sizes = [1, 32], strides = [1, 1]} : vector<1x64xf32> to vector<1x32xf32>
    %23 = vector.extract_strided_slice %21 {offsets = [0, 32], sizes = [1, 32], strides = [1, 1]} : vector<1x64xf32> to vector<1x32xf32>
    %cst_16 = arith.constant 0.000000e+00 : f32
    %24 = vector.broadcast %cst_16 : f32 to vector<1x32xf32>
    %25 = arith.maximumf %23, %24 : vector<1x32xf32>
    %26 = math.absf %23 : vector<1x32xf32>
    %cst_17 = arith.constant 0.000000e+00 : f32
    %27 = vector.broadcast %cst_17 : f32 to vector<1x32xf32>
    %28 = arith.subf %27, %26 : vector<1x32xf32>
    %29 = math.exp %28 : vector<1x32xf32>
    %30 = math.log1p %29 : vector<1x32xf32>
    %31 = arith.addf %25, %30 : vector<1x32xf32>
    %c0_18 = arith.constant 0 : index
    %c0_19 = arith.constant 0 : index
    %c0_20 = arith.constant 0 : index
    %32 = vector.load %arg6[%c0_18, %c0_19, %c0_20] : memref<1x1x128xf32, #tpu.memory_space<vmem>>, vector<1x1x128xf32>
    %33 = vector.extract_strided_slice %32 {offsets = [0, 0, 0], sizes = [1, 1, 32], strides = [1, 1, 1]} : vector<1x1x128xf32> to vector<1x1x32xf32>
    %34 = vector.shape_cast %33 : vector<1x1x32xf32> to vector<1x32xf32>
    %35 = arith.mulf %31, %34 : vector<1x32xf32>
    %36 = arith.addf %22, %35 : vector<1x32xf32>
    %37 = arith.truncf %36 : vector<1x32xf32> to vector<1x32xbf16>
    %c0_21 = arith.constant 0 : index
    %c0_22 = arith.constant 0 : index
    %38 = vector.load %arg4[%c0_21, %c0_22] : memref<32x128xbf16, #tpu.memory_space<vmem>>, vector<32x128xbf16>
    %cst_23 = arith.constant dense<0.000000e+00> : vector<1x128xf32>
    %39 = tpu.matmul %37, %38, %cst_23 {dimension_numbers = #tpu.dot_dimension_numbers<[1], [0], [0], [1], [0, 0, 1, 1], [], []>} : vector<1x32xbf16>, vector<32x128xbf16>, vector<1x128xf32> -> vector<1x128xf32>
    %40 = arith.addf %39, %3 : vector<1x128xf32>
    %41 = vector.shape_cast %40 : vector<1x128xf32> to vector<1x1x128xf32>
    %c0_24 = arith.constant 0 : index
    %c0_25 = arith.constant 0 : index
    %c0_26 = arith.constant 0 : index
    %42 = vector.load %arg7[%c0_24, %c0_25, %c0_26] : memref<1x1x128xf32, #tpu.memory_space<vmem>>, vector<1x1x128xf32>
    tpu.vector_store %arg7[%c0_24, %c0_25, %c0_26], %41 {strides = array<i32>} : memref<1x1x128xf32, #tpu.memory_space<vmem>>, vector<1x1x128xf32>,
    return
  }
  func.func @transform_0(%arg0: i32) -> (i32, i32, i32) {
    %c0_i32 = arith.constant 0 : i32
    %c0_i32_0 = arith.constant 0 : i32
    %c0_i32_1 = arith.constant 0 : i32
    return %arg0, %c0_i32, %c0_i32_0 : i32, i32, i32
  }
  func.func @transform_1(%arg0: i32) -> (i32, i32) {
    %c0_i32 = arith.constant 0 : i32
    %c0_i32_0 = arith.constant 0 : i32
    %c0_i32_1 = arith.constant 0 : i32
    return %c0_i32, %c0_i32_0 : i32, i32
  }
  func.func @transform_2(%arg0: i32) -> (i32, i32) {
    %c0_i32 = arith.constant 0 : i32
    %c0_i32_0 = arith.constant 0 : i32
    %c0_i32_1 = arith.constant 0 : i32
    return %c0_i32, %c0_i32_0 : i32, i32
  }
  func.func @transform_3(%arg0: i32) -> (i32, i32) {
    %c0_i32 = arith.constant 0 : i32
    %c0_i32_0 = arith.constant 0 : i32
    %c0_i32_1 = arith.constant 0 : i32
    return %c0_i32, %c0_i32_0 : i32, i32
  }
  func.func @transform_4(%arg0: i32) -> (i32, i32) {
    %c0_i32 = arith.constant 0 : i32
    %c0_i32_0 = arith.constant 0 : i32
    %c0_i32_1 = arith.constant 0 : i32
    return %c0_i32, %c0_i32_0 : i32, i32
  }
  func.func @transform_5(%arg0: i32) -> (i32, i32, i32) {
    %c0_i32 = arith.constant 0 : i32
    %c0_i32_0 = arith.constant 0 : i32
    %c0_i32_1 = arith.constant 0 : i32
    return %arg0, %c0_i32, %c0_i32_0 : i32, i32, i32
  }
  func.func @transform_6(%arg0: i32) -> (i32, i32, i32) {
    %c0_i32 = arith.constant 0 : i32
    %c0_i32_0 = arith.constant 0 : i32
    %c0_i32_1 = arith.constant 0 : i32
    return %arg0, %c0_i32, %c0_i32_0 : i32, i32, i32
  }
}

</mosaic_0001>

<bundles_post_ra>
// kernel: tpu_custom_call.1
= control target key start
LH: loop header
LB: loop body
LE: loop exit
PB: predicated region body
PF: predicated region fallthrough
CT: control target
= control target key end

     0   :  { %11 = vsyncpa [#allocation4], 0  ;;  %s1756_s0 = inlined_call_operand.hbm [shape: bf16[2,256,128], index: 0, kind: input, shape index: {}]   ;;  %s1757_s1 = inlined_call_operand.vmem [shape: bf16[128,32], index: 1, kind: input, shape index: {}]   ;;  %s1758_s2 = inlined_call_operand.vmem [shape: bf16[32,64], index: 2, kind: input, shape index: {}]   ;;  %s1759_s3 = inlined_call_operand.vmem [shape: bf16[32,128], index: 3, kind: input, shape index: {}]   ;;  %s1760_s4 = inlined_call_operand.vmem [shape: f32[3,128], index: 4, kind: input, shape index: {}]   ;;  %s1761_s5 = inlined_call_operand.vmem [shape: f32[2,1,128], index: 5, kind: input, shape index: {}]   ;;  %s1762_s6 = inlined_call_operand.hbm [shape: f32[2,1,128], index: 6, kind: output, shape index: {}]  }
   0x1   :  { %13 = vsyncpa [#allocation4 + $0x1], 0 }
   0x2   :  { %14 = vsyncpa [#allocation5], 0 }
   0x3   :  { %16 = vsyncpa [#allocation5 + $0x1], 0  ;;  %s1428_s21 = smov 0   ;;  %s1430_s22 = smov 0  }
   0x4   :  { %s1432_s23 = smov 0   ;;  %s1434_s24 = smov 0  }
   0x5 LB: > { %s1449_s25 = sadd.s32 4294967295, %s1383_s24   ;;  %s1054_s26 = sadd.s32 4294967294, %s1383_s24   ;;  %s1383_s24 = sphi %s1434_s24, %s1777_s24   ;;  %s1379_s23 = sphi %s1432_s23, %s1776_s23   ;;  %s1375_s22 = sphi %s1430_s22, %s1775_s22   ;;  %s1371_s21 = sphi %s1428_s21, %s1774_s21  }
   0x6   : > { %s1453_s27 = sadd.s32 1, %s1383_s24   ;;  %s29_s28 = sadd.s32 1, %s1379_s23 }
   0x7   : > { %s26_s29 = ssub.s32 %s1383_s24, %s1453_s27  ;;  %p36_p0 = scmp.ne.s32.totalorder %s1379_s23, %s1375_s22 }
   0x8   : > { %p27_p1 = scmp.eq.s32.totalorder %s26_s29, 0  ;;  %p37_p2 = scmp.eq.s32.totalorder %s1383_s24, 0 }
   0x9   : > { %p42_p3 = scmp.ne.s32.totalorder %s1375_s22, %s1371_s21  ;;  %p43_p4 = scmp.eq.s32.totalorder %s1449_s25, 0 }
   0xa   : > { %s1465_s30 = scalar_select %p27_p1, %s1379_s23, %s29_s28  }
   0xb   : > { %p1467_p5 = por %p37_p2, %p36_p0  ;;  %p1471_p6 = por %p43_p4, %p42_p3 }
   0xc   : > { %p176_p7 = scmp.eq.s32.totalorder %s1449_s25, 1  ;;  %p182_p8 = scmp.eq.s32.totalorder %s1054_s26, 1 }
   0xd   : > { %s1766_s8 = scalar_select %p1471_p6, 1, 0 }
   0xe   : > { %p1219_p10 = scmp.lt.s32.totalorder %s1383_s24, 2  ;;  %p1478_p11 = por %p176_p7, %p36_p0 }
   0xf   : > { %p1482_p12 = por %p182_p8, %p42_p3  ;;  %s214_s11 = sand.u32 1, %s1379_s23  }
  0x10   : > { %s1767_s9 = scalar_select %p1478_p11, 1, 0 }
  0x11   : > { %s1768_s10 = scalar_select %p1482_p12, 1, 0 }
  0x12   : > { %s1096_s12 = sshll.u32 %s1383_s24, 11  ;;  %s1057_s13 = sshll.u32 %s214_s11, 7 }
  0x13   : > { %s1491_s16 = scalar_lea.hbm %s1756_s0, %s1096_s12  ;;  %s218_s17 = scalar_lea.vmem [#allocation3], %s1057_s13 }
  0x14   : > { %s225_s18 = sshll.u32 %s218_s17, 4  ;;  %p1495_p13 = pnand %p1219_p10, %p1467_p5  ;;  %s1499_s18 = int_to_ptr.vmem [resolvable:$true] %s225_s18 }
  0x15   : > { %s1501_s20 = scalar_lea.sflag [#allocation4], %s214_s11  ;;  %s1291_s26 = scalar_lea.hbm %s1491_s16, 2048 }
  0x16   : > { %p1292_p0 = scmp.ne.s32.totalorder %s1491_s16, %s1291_s26  ;;  %p1293_p1 = pneg %p1495_p13 }
  0x17   : > { %s1296_s12 = scalar_lea.hbm %s1756_s0, 4096  ;;  %p1297_p4 = scmp.lt.s32.totalorder %s1491_s16, %s1756_s0 }
  0x18   : > { %p1294_p2 = pnand %p1293_p1, %p1292_p0  ;;  %p1298_p5 = scmp.lt.s32.totalorder %s1296_s12, %s1291_s26 }
  0x1a   : > { %p1295_p3 = pneg %p1294_p2  ;;  %p1299_p7 = por %p1298_p5, %p1297_p4 }
  0x1c   : > { %p1300_p8 = pnand %p1299_p7, %p1295_p3 }
  0x1e   : > { %1303 = shalt.err (!%p1300_p8)
}
  0x1f   : > { %s1304_s11 = scalar_lea.vmem %s1499_s18, 2048  ;;  %s1385_s14 = smov [#allocation3]  }
  0x20   : > { %p1305_p10 = scmp.ne.s32.totalorder %s1499_s18, %s1304_s11  ;;  %s1309_s15 = sshll.u32 %s1385_s14, 4  ;;  %s1310_s15 = int_to_ptr.vmem [resolvable:$false] %s1309_s15 }
  0x21   : > { %s1311_s17 = scalar_lea.vmem %s1310_s15, 4096  ;;  %p1312_p2 = scmp.lt.s32.totalorder %s1499_s18, %s1310_s15 }
  0x22   : > { %p1307_p9 = pnand %p1305_p10, %p1293_p1  ;;  %p1313_p12 = scmp.lt.s32.totalorder %s1311_s17, %s1304_s11 }
  0x24   : > { %p1308_p0 = pneg %p1307_p9  ;;  %p1314_p11 = por %p1313_p12, %p1312_p2 }
  0x26   : > { %p1315_p6 = pnand %p1314_p11, %p1308_p0 }
  0x28   : > { %1318 = shalt.err (!%p1315_p6)
}
  0x29   : > { %s1386_s26 = smov 64   ;;  %s1387_s28 = smov 4  }
  0x2a   : > { %1214 = dma.hbm_to_vmem [thread:$0]  (!%p1495_p13), %s1491_s16, 2048, %s1499_s18, %s1501_s20, %s1386_s26, %s1386_s26, %s1387_s28  }
  0x2b   : > { %p1060_p9 = scmp.ge.s32.totalorder %s1383_s24, 1  ;;  %p239_p1 = scmp.lt.s32.totalorder %s1383_s24, 3 }
  0x2d   : > { %p240_p3 = pnand %p1060_p9, %p239_p1 }
  0x2e   : > { %s1525_s29 = sand.u32 (!%p240_p3), 1, %s1375_s22   ;;  %p1770_p6 = scmp.ne.s32.totalorder (!%p240_p3), %s1766_s8, 0 }
  0x2f   : > { %243 = sbr.rel (%p240_p3) target bundleno = 942 (0x3ae), region = 44  ;;  %s1061_s12 = sshll.u32 (!%p240_p3), %s1525_s29, 7 }
  0x30   : > { %s246_s7 = scalar_lea.sflag (!%p240_p3), [#allocation4], %s1525_s29  ;;  %s1529_s13 = scalar_lea.vmem (!%p240_p3), [#allocation3], %s1061_s12 }
  0x34   : > { %1362 = dma.done.wait (%p1770_p6), %s246_s7, 2048  }
  0x35   : > { %1364 = vsyncadd (%p1770_p6), %s246_s7, 4294965248  ;;  %v1259_v0 = vld [vmem:[%s1757_s1 + $0x38] sm:$0xff]   ;;  %v1260_v1 = vld [vmem:[%s1757_s1 + $0x30] sm:$0xff]   ;;  %v1388_v25 = vmov 0.0   ;;  %vm1389_vm0 = vmmov 0   ;;  %p280_p11 = scmp.lt.s32.totalorder %s1449_s25, 1  ;;  %v333_v28 = vlaneseq }
  0x36   : > { %1127 = vmatprep.subr.bf16.mxu0 %v1259_v0  ;;  %1191 = vmatprep.subr.bf16.mxu1 %v1259_v0  ;;  %v1261_v2 = vld [vmem:[%s1757_s1 + $0x28] sm:$0xff]   ;;  %v1262_v3 = vld [vmem:[%s1757_s1 + $0x20] sm:$0xff]   ;;  %v1263_v5 = vld [vmem:[%s1757_s1 + $0x18] sm:$0xff]   ;;  %s1390_s28 = smov 32   ;;  %vm674_vm1 = vcmask 261120   ;;  %s1391_s11 = smov 96  }
  0x37   : > { %1128 = vmatpush3.bf16.msra.mxu0 %v1259_v0  ;;  %1199 = vmatpush3.bf16.msra.mxu1 %v1259_v0  ;;  %v1267_v4 = vld [vmem:[%s1529_s13] sm:$0xff]   ;;  %v1264_v6 = vld [vmem:[%s1757_s1 + $0x10] sm:$0xff]   ;;  %v1265_v8 = vld [vmem:[%s1757_s1 + $0x8] sm:$0xff]   ;;  %v334_v29 = vshrl.u32 %v333_v28, 7  ;;  %s1093_s14 = sshll.u32 %s1449_s25, 4  ;;  %s279_s8 = scalar_lea.vmem [#allocation6], %s1525_s29 }
  0x38   : > { %1129 = vmatprep.subr.bf16.mxu0 %v1260_v1  ;;  %1192 = vmatprep.subr.bf16.mxu1 %v1260_v1  ;;  %v1277_v7 = vld [vmem:[%s1529_s13 + $0x50] sm:$0xff]   ;;  %v1266_v9 = vld [vmem:[%s1757_s1] sm:$0xff]   ;;  %v1268_v10 = vld [vmem:[%s1529_s13 + $0x8] sm:$0xff]   ;;  %p1771_p13 = scmp.ne.s32.totalorder %s1767_s9, 0 }
  0x39   : > { %1143 = vmatprep.mubr.bf16.mxu0 %v1267_v4  ;;  %1163 = vmatprep.mubr.bf16.mxu1 %v1277_v7  ;;  %v1278_v11 = vld [vmem:[%s1529_s13 + $0x58] sm:$0xff]   ;;  %v1269_v12 = vld [vmem:[%s1529_s13 + $0x10] sm:$0xff]   ;;  %v1279_v13 = vld [vmem:[%s1529_s13 + $0x60] sm:$0xff]   ;;  %v335_v30 = vsub.s32 0, %v334_v29 }
  0x3a   : > { %v1270_v14 = vld [vmem:[%s1529_s13 + $0x18] sm:$0xff]   ;;  %v1280_v15 = vld [vmem:[%s1529_s13 + $0x68] sm:$0xff]   ;;  %v1271_v16 = vld [vmem:[%s1529_s13 + $0x20] sm:$0xff]  }
  0x3b   : > { %1130 = vmatpush3.bf16.msra.mxu0 %v1260_v1  ;;  %1200 = vmatpush3.bf16.msra.mxu1 %v1260_v1  ;;  %v1281_v17 = vld [vmem:[%s1529_s13 + $0x70] sm:$0xff]   ;;  %v1272_v18 = vld [vmem:[%s1529_s13 + $0x28] sm:$0xff]   ;;  %v1282_v19 = vld [vmem:[%s1529_s13 + $0x78] sm:$0xff]  }
  0x3c   : > { %1131 = vmatprep.subr.bf16.mxu0 %v1261_v2  ;;  %1193 = vmatprep.subr.bf16.mxu1 %v1261_v2  ;;  %v1273_v20 = vld [vmem:[%s1529_s13 + $0x30] sm:$0xff]   ;;  %v1274_v21 = vld [vmem:[%s1529_s13 + $0x38] sm:$0xff]   ;;  %v1275_v22 = vld [vmem:[%s1529_s13 + $0x40] sm:$0xff]  }
  0x3d   : > { %v1276_v23 = vld [vmem:[%s1529_s13 + $0x48] sm:$0xff]   ;;  %v1284_v26 = vld [vmem:[%s1758_s2] sm:$0xff]   ;;  %s281_s13 = scalar_select %p280_p11, %s1449_s25, 1 }
  0x3e   : > { %v1283_v24 = vld [vmem:[%s1758_s2 + $0x8] sm:$0xff]   ;;  %v1594_v31 = vld [vmem:[%s1760_s4] sm:$0x7]  ;;  %s1392_s25 = smov [#allocation6]  }
  0x3f   : > { %1132 = vmatpush3.bf16.msra.mxu0 %v1261_v2  ;;  %1201 = vmatpush3.bf16.msra.mxu1 %v1261_v2  ;;  %s282_s26 = scalar_lea.vmem %s1761_s5, %s281_s13  ;;  %v1597_v32 = vrot.slane %v1594_v31, %v335_v30  ;;  %s979_s13 = sshll.u32 %s279_s8, 4  ;;  %s1715_s13 = int_to_ptr.vmem [resolvable:$true] %s979_s13 }
  0x40   : > { %1133 = vmatprep.subr.bf16.mxu0 %v1262_v3  ;;  %1194 = vmatprep.subr.bf16.mxu1 %v1262_v3  ;;  %v1089_v27 = vld [vmem:[%s282_s26] ss:$0 sm:$0xff]  ;;  %s1713_s26 = scalar_lea.hbm %s1762_s6, %s1093_s14  ;;  %s1319_s12 = scalar_lea.vmem %s1715_s13, 16 }
  0x41   : > { %894 = vrot.lane.b32.xlu0 %v1089_v27, %s1390_s28  ;;  %s967_s28 = scalar_lea.sflag [#allocation5], %s1525_s29  ;;  %p1320_p12 = scmp.ne.s32.totalorder %s1715_s13, %s1319_s12 }
  0x42   : > { %s1323_s7 = sshll.u32 %s1392_s25, 4  ;;  %s1324_s7 = int_to_ptr.vmem [resolvable:$false] %s1323_s7 }
  0x43   : > { %1134 = vmatpush3.bf16.msra.mxu0 %v1262_v3  ;;  %1202 = vmatpush3.bf16.msra.mxu1 %v1262_v3  ;;  %p1321_p4 = pnand %p1320_p12, %p1771_p13  ;;  %s1325_s16 = scalar_lea.vmem %s1324_s7, 32 }
  0x44   : > { %1135 = vmatprep.subr.bf16.mxu0 %v1263_v5  ;;  %1195 = vmatprep.subr.bf16.mxu1 %v1263_v5  ;;  %p1326_p7 = scmp.lt.s32.totalorder %s1715_s13, %s1324_s7  ;;  %p1327_p8 = scmp.lt.s32.totalorder %s1325_s16, %s1319_s12 }
  0x45   : > { %p1322_p5 = pneg %p1321_p4 }
  0x46   : > { %p1328_p10 = por %p1327_p8, %p1326_p7 }
  0x47   : > { %1136 = vmatpush3.bf16.msra.mxu0 %v1263_v5  ;;  %1203 = vmatpush3.bf16.msra.mxu1 %v1263_v5 }
  0x48   : > { %1137 = vmatprep.subr.bf16.mxu0 %v1264_v6  ;;  %1196 = vmatprep.subr.bf16.mxu1 %v1264_v6  ;;  %p1329_p0 = pnand %p1328_p10, %p1322_p5 }
  0x4b   : > { %1138 = vmatpush3.bf16.msra.mxu0 %v1264_v6  ;;  %1204 = vmatpush3.bf16.msra.mxu1 %v1264_v6 }
  0x4c   : > { %1139 = vmatprep.subr.bf16.mxu0 %v1265_v8  ;;  %1197 = vmatprep.subr.bf16.mxu1 %v1265_v8 }
  0x4f   : > { %1140 = vmatpush3.bf16.msra.mxu0 %v1265_v8  ;;  %1205 = vmatpush3.bf16.msra.mxu1 %v1265_v8 }
  0x50   : > { %1141 = vmatprep.subr.bf16.mxu0 %v1266_v9  ;;  %1198 = vmatprep.subr.bf16.mxu1 %v1266_v9 }
  0x53   : > { %1142 = vmatpush3.bf16.msra.mxu0 %v1266_v9  ;;  %1206 = vmatpush3.bf16.msra.mxu1 %v1266_v9 }
  0x54   : > { %1175 = vmatprep.subr.bf16.mxu1 %v1388_v25 }
  0x56   : > { %1144 = vmatmul.mubr.bf16.vlgmr.msra.gmra.mxu0 %v1268_v10  ;;  %1164 = vmatmul.mubr.bf16.vlgmr.msra.gmra.mxu1 %v1278_v11 }
  0x57   : > { %1147 = vmatprep.mubr.bf16.mxu0 %v1269_v12  ;;  %1167 = vmatprep.mubr.bf16.mxu1 %v1279_v13 }
  0x58   : > { %1176 = vmatpush3.bf16.msra.mxu1 %v1283_v24 }
  0x59   : > { %1177 = vmatprep.subr.bf16.mxu1 %v1388_v25 }
  0x5c   : > { %1178 = vmatpush3.bf16.msra.mxu1 %v1284_v26 }
  0x5d   : > { %1183 = vmatprep.subr.bf16.mxu1 %v1388_v25 }
  0x5e   : > { %1148 = vmatmul.mubr.bf16.gmra.mxu0 %v1270_v14  ;;  %1168 = vmatmul.mubr.bf16.gmra.mxu1 %v1280_v15 }
  0x5f   : > { %1151 = vmatprep.mubr.bf16.mxu0 %v1271_v16  ;;  %1171 = vmatprep.mubr.bf16.mxu1 %v1281_v17 }
  0x66   : > { %1152 = vmatmul.mubr.bf16.gmra.mxu0 %v1272_v18  ;;  %1172 = vmatmul.mubr.bf16.gmra.mxu1 %v1282_v19 }
  0x67   : > { %1155 = vmatprep.mubr.bf16.mxu0 %v1273_v20  ;;  %1179 = vmatprep.mubr.msk.bf16.mxu1 %vm1389_vm0, %v1388_v25 }
  0x6e   : > { %1156 = vmatmul.mubr.bf16.gmra.mxu0 %v1274_v21 }
  0x6f   : > { %1159 = vmatprep.mubr.bf16.mxu0 %v1275_v22 }
  0x76   : > { %1160 = vmatmul.mubr.bf16.gmra.mxu0 %v1276_v23 }
 0x116   : > { %v1145_v33 = vpop.f32.mrf.mxu0  ;;  %v1165_v34 = vpop.f32.mrf.mxu1 }
 0x117   : > { %v524_v35 = vadd.f32 %v1145_v33, %v1597_v32  ;;  %v604_v36 = vadd.f32 %v1165_v34, %v1597_v32 }
 0x118   : > { %v515_v37 = vpop.f32.mrf.mxu0  ;;  %v595_v38 = vpop.f32.mrf.mxu1 }
 0x119   : > { %v644_v39 = vmax.f32 %v524_v35, 0.0  ;;  %v516_v40 = vadd.f32 %v515_v37, %v1597_v32  ;;  %v664_v41 = vmax.f32 %v604_v36, 0.0  ;;  %v596_v42 = vadd.f32 %v595_v38, %v1597_v32 }
 0x11a   : > { %v1146_v43 = vpop.f32.mrf.mxu0  ;;  %v1166_v44 = vpop.f32.mrf.mxu1 }
 0x11b   : > { %677 = vst.msk [vmem:[#allocation2 + $0x10] sm:$0xff] %vm674_vm1, %v644_v39  ;;  %v642_v45 = vmax.f32 %v516_v40, 0.0  ;;  %v527_v46 = vadd.f32 %v1146_v43, %v1597_v32  ;;  %697 = vst.msk [vmem:[#allocation2 + $0xb0] sm:$0xff] %vm674_vm1, %v664_v41  ;;  %v662_v47 = vmax.f32 %v596_v42, 0.0  ;;  %v607_v48 = vadd.f32 %v1166_v44, %v1597_v32 }
 0x11c   : > { %v518_v49 = vpop.f32.mrf.mxu0  ;;  %v598_v50 = vpop.f32.mrf.mxu1 }
 0x11d   : > { %675 = vst.msk [vmem:[#allocation2] sm:$0xff] %vm674_vm1, %v642_v45  ;;  %v645_v51 = vmax.f32 %v527_v46, 0.0  ;;  %v519_v52 = vadd.f32 %v518_v49, %v1597_v32  ;;  %695 = vst.msk [vmem:[#allocation2 + $0xa0] sm:$0xff] %vm674_vm1, %v662_v47  ;;  %v665_v53 = vmax.f32 %v607_v48, 0.0  ;;  %v599_v54 = vadd.f32 %v598_v50, %v1597_v32 }
 0x11e   : > { %v1149_v55 = vpop.f32.mrf.mxu0  ;;  %v1169_v56 = vpop.f32.mrf.mxu1 }
 0x11f   : > { %678 = vst.msk [vmem:[#allocation2 + $0x18] sm:$0xff] %vm674_vm1, %v645_v51  ;;  %v643_v57 = vmax.f32 %v519_v52, 0.0  ;;  %v540_v58 = vadd.f32 %v1149_v55, %v1597_v32  ;;  %698 = vst.msk [vmem:[#allocation2 + $0xb8] sm:$0xff] %vm674_vm1, %v665_v53  ;;  %v663_v59 = vmax.f32 %v599_v54, 0.0  ;;  %v620_v60 = vadd.f32 %v1169_v56, %v1597_v32 }
 0x120   : > { %v531_v61 = vpop.f32.mrf.mxu0  ;;  %v611_v62 = vpop.f32.mrf.mxu1 }
 0x121   : > { %676 = vst.msk [vmem:[#allocation2 + $0x8] sm:$0xff] %vm674_vm1, %v643_v57  ;;  %v648_v63 = vmax.f32 %v540_v58, 0.0  ;;  %v532_v0 = vadd.f32 %v531_v61, %v1597_v32  ;;  %696 = vst.msk [vmem:[#allocation2 + $0xa8] sm:$0xff] %vm674_vm1, %v663_v59  ;;  %v668_v1 = vmax.f32 %v620_v60, 0.0  ;;  %v612_v2 = vadd.f32 %v611_v62, %v1597_v32 }
 0x122   : > { %v1150_v3 = vpop.f32.mrf.mxu0  ;;  %v1170_v4 = vpop.f32.mrf.mxu1  ;;  %v709_v20 = vld [vmem:[#allocation2 + $0x10] sm:$0xff] }
 0x123   : > { %681 = vst.msk [vmem:[#allocation2 + $0x30] sm:$0xff] %vm674_vm1, %v648_v63  ;;  %v646_v5 = vmax.f32 %v532_v0, 0.0  ;;  %v543_v6 = vadd.f32 %v1150_v3, %v1597_v32  ;;  %701 = vst.msk [vmem:[#allocation2 + $0xd0] sm:$0xff] %vm674_vm1, %v668_v1  ;;  %v666_v8 = vmax.f32 %v612_v2, 0.0  ;;  %v623_v9 = vadd.f32 %v1170_v4, %v1597_v32 }
 0x124   : > { %v534_v7 = vpop.f32.mrf.mxu0  ;;  %v614_v10 = vpop.f32.mrf.mxu1  ;;  %v707_v13 = vld [vmem:[#allocation2] sm:$0xff]  ;;  %v742_v39 = vsel %vm674_vm1, %v709_v20, 0.0 }
 0x125   : > { %679 = vst.msk [vmem:[#allocation2 + $0x20] sm:$0xff] %vm674_vm1, %v646_v5  ;;  %v649_v11 = vmax.f32 %v543_v6, 0.0  ;;  %v535_v12 = vadd.f32 %v534_v7, %v1597_v32  ;;  %699 = vst.msk [vmem:[#allocation2 + $0xc0] sm:$0xff] %vm674_vm1, %v666_v8  ;;  %v669_v15 = vmax.f32 %v623_v9, 0.0  ;;  %v615_v16 = vadd.f32 %v614_v10, %v1597_v32 }
 0x126   : > { %v1153_v14 = vpop.f32.mrf.mxu0  ;;  %v1173_v17 = vpop.f32.mrf.mxu1  ;;  %v739_v27 = vsel %vm674_vm1, %v707_v13, 0.0  ;;  %v710_v33 = vld [vmem:[#allocation2 + $0x18] sm:$0xff] }
 0x127   : > { %682 = vst.msk [vmem:[#allocation2 + $0x38] sm:$0xff] %vm674_vm1, %v649_v11  ;;  %v647_v18 = vmax.f32 %v535_v12, 0.0  ;;  %v556_v19 = vadd.f32 %v1153_v14, %v1597_v32  ;;  %702 = vst.msk [vmem:[#allocation2 + $0xd8] sm:$0xff] %vm674_vm1, %v669_v15  ;;  %v667_v23 = vmax.f32 %v615_v16, 0.0  ;;  %v636_v24 = vadd.f32 %v1173_v17, %v1597_v32 }
 0x128   : > { %v708_v21 = vld [vmem:[#allocation2 + $0x8] sm:$0xff]  ;;  %v547_v22 = vpop.f32.mrf.mxu0  ;;  %v627_v26 = vpop.f32.mrf.mxu1  ;;  %v744_v48 = vsel %vm674_vm1, %v710_v33, 0.0 }
 0x129   : > { %v740_v28 = vsel %vm674_vm1, %v708_v21, 0.0  ;;  %680 = vst.msk [vmem:[#allocation2 + $0x28] sm:$0xff] %vm674_vm1, %v647_v18  ;;  %v652_v29 = vmax.f32 %v556_v19, 0.0  ;;  %v548_v30 = vadd.f32 %v547_v22, %v1597_v32  ;;  %700 = vst.msk [vmem:[#allocation2 + $0xc8] sm:$0xff] %vm674_vm1, %v667_v23  ;;  %v672_v36 = vmax.f32 %v636_v24, 0.0 }
 0x12a   : > { %v741_v34 = vadd.f32 %v740_v28, %v739_v27  ;;  %v1154_v35 = vpop.f32.mrf.mxu0  ;;  %v628_v37 = vadd.f32 %v627_v26, %v1597_v32  ;;  %v1174_v38 = vpop.f32.mrf.mxu1  ;;  %v713_v58 = vld [vmem:[#allocation2 + $0x30] sm:$0xff] }
 0x12b   : > { %685 = vst.msk [vmem:[#allocation2 + $0x50] sm:$0xff] %vm674_vm1, %v652_v29  ;;  %v650_v40 = vmax.f32 %v548_v30, 0.0  ;;  %v559_v41 = vadd.f32 %v1154_v35, %v1597_v32  ;;  %v639_v42 = vadd.f32 %v1174_v38, %v1597_v32  ;;  %705 = vst.msk [vmem:[#allocation2 + $0xf0] sm:$0xff] %vm674_vm1, %v672_v36  ;;  %v750_v5 = vsel %vm674_vm1, %v713_v58, 0.0 }
 0x12c   : > { %v743_v43 = vadd.f32 %v742_v39, %v741_v34  ;;  %v711_v44 = vld [vmem:[#allocation2 + $0x20] sm:$0xff]  ;;  %v550_v45 = vpop.f32.mrf.mxu0  ;;  %v670_v46 = vmax.f32 %v628_v37, 0.0  ;;  %v630_v47 = vpop.f32.mrf.mxu1 }
 0x12d   : > { %683 = vst.msk [vmem:[#allocation2 + $0x40] sm:$0xff] %vm674_vm1, %v650_v40  ;;  %v653_v49 = vmax.f32 %v559_v41, 0.0  ;;  %v551_v50 = vadd.f32 %v550_v45, %v1597_v32  ;;  %v673_v51 = vmax.f32 %v639_v42, 0.0  ;;  %v631_v54 = vadd.f32 %v630_v47, %v1597_v32 }
 0x12e   : > { %v745_v52 = vadd.f32 %v744_v48, %v743_v43  ;;  %v1157_v53 = vpop.f32.mrf.mxu0  ;;  %703 = vst.msk [vmem:[#allocation2 + $0xe0] sm:$0xff] %vm674_vm1, %v670_v46  ;;  %v746_v55 = vsel %vm674_vm1, %v711_v44, 0.0  ;;  %v714_v2 = vld [vmem:[#allocation2 + $0x38] sm:$0xff] }
 0x12f   : > { %686 = vst.msk [vmem:[#allocation2 + $0x58] sm:$0xff] %vm674_vm1, %v653_v49  ;;  %v651_v56 = vmax.f32 %v551_v50, 0.0  ;;  %v572_v57 = vadd.f32 %v1157_v53, %v1597_v32  ;;  %706 = vst.msk [vmem:[#allocation2 + $0xf8] sm:$0xff] %vm674_vm1, %v673_v51  ;;  %v671_v62 = vmax.f32 %v631_v54, 0.0  ;;  %v752_v11 = vsel %vm674_vm1, %v714_v2, 0.0 }
 0x130   : > { %v747_v59 = vadd.f32 %v746_v55, %v745_v52  ;;  %v712_v60 = vld [vmem:[#allocation2 + $0x28] sm:$0xff]  ;;  %v563_v61 = vpop.f32.mrf.mxu0 }
 0x131   : > { %v748_v63 = vsel %vm674_vm1, %v712_v60, 0.0  ;;  %684 = vst.msk [vmem:[#allocation2 + $0x48] sm:$0xff] %vm674_vm1, %v651_v56  ;;  %v656_v0 = vmax.f32 %v572_v57, 0.0  ;;  %v564_v1 = vadd.f32 %v563_v61, %v1597_v32  ;;  %704 = vst.msk [vmem:[#allocation2 + $0xe8] sm:$0xff] %vm674_vm1, %v671_v62  ;;  %v727_v62 = vld [vmem:[#allocation2 + $0xa0] sm:$0xff] }
 0x132   : > { %v749_v3 = vadd.f32 %v748_v63, %v747_v59  ;;  %v1158_v4 = vpop.f32.mrf.mxu0  ;;  %v717_v19 = vld [vmem:[#allocation2 + $0x50] sm:$0xff] }
 0x133   : > { %689 = vst.msk [vmem:[#allocation2 + $0x70] sm:$0xff] %vm674_vm1, %v656_v0  ;;  %v654_v6 = vmax.f32 %v564_v1, 0.0  ;;  %v575_v7 = vadd.f32 %v1158_v4, %v1597_v32  ;;  %v758_v30 = vsel %vm674_vm1, %v717_v19, 0.0  ;;  %v728_v1 = vld [vmem:[#allocation2 + $0xa8] sm:$0xff]  ;;  %v729_v4 = vld [vmem:[#allocation2 + $0xb0] sm:$0xff]  ;;  %v734_v19 = vld [vmem:[#allocation2 + $0xd8] sm:$0xff] }
 0x134   : > { %v751_v8 = vadd.f32 %v750_v5, %v749_v3  ;;  %v715_v9 = vld [vmem:[#allocation2 + $0x40] sm:$0xff]  ;;  %v566_v10 = vpop.f32.mrf.mxu0  ;;  %v778_v3 = vsel %vm674_vm1, %v727_v62, 0.0 }
 0x135   : > { %687 = vst.msk [vmem:[#allocation2 + $0x60] sm:$0xff] %vm674_vm1, %v654_v6  ;;  %v657_v12 = vmax.f32 %v575_v7, 0.0  ;;  %v567_v13 = vadd.f32 %v566_v10, %v1597_v32  ;;  %v754_v16 = vsel %vm674_vm1, %v715_v9, 0.0  ;;  %v780_v6 = vsel %vm674_vm1, %v728_v1, 0.0  ;;  %v730_v7 = vld [vmem:[#allocation2 + $0xb8] sm:$0xff] }
 0x136   : > { %v753_v14 = vadd.f32 %v752_v11, %v751_v8  ;;  %v1161_v15 = vpop.f32.mrf.mxu0  ;;  %v718_v27 = vld [vmem:[#allocation2 + $0x58] sm:$0xff]  ;;  %v782_v9 = vsel %vm674_vm1, %v729_v4, 0.0  ;;  %v731_v11 = vld [vmem:[#allocation2 + $0xc0] sm:$0xff] }
 0x137   : > { %690 = vst.msk [vmem:[#allocation2 + $0x78] sm:$0xff] %vm674_vm1, %v657_v12  ;;  %v655_v17 = vmax.f32 %v567_v13, 0.0  ;;  %v588_v18 = vadd.f32 %v1161_v15, %v1597_v32  ;;  %v760_v38 = vsel %vm674_vm1, %v718_v27, 0.0  ;;  %v784_v12 = vsel %vm674_vm1, %v730_v7, 0.0  ;;  %v732_v13 = vld [vmem:[#allocation2 + $0xc8] sm:$0xff] }
 0x138   : > { %v755_v20 = vadd.f32 %v754_v16, %v753_v14  ;;  %v716_v21 = vld [vmem:[#allocation2 + $0x48] sm:$0xff]  ;;  %v579_v22 = vpop.f32.mrf.mxu0  ;;  %v786_v15 = vsel %vm674_vm1, %v731_v11, 0.0  ;;  %v733_v16 = vld [vmem:[#allocation2 + $0xd0] sm:$0xff] }
 0x139   : > { %v756_v23 = vsel %vm674_vm1, %v716_v21, 0.0  ;;  %688 = vst.msk [vmem:[#allocation2 + $0x68] sm:$0xff] %vm674_vm1, %v655_v17  ;;  %v660_v24 = vmax.f32 %v588_v18, 0.0  ;;  %v580_v26 = vadd.f32 %v579_v22, %v1597_v32  ;;  %v788_v18 = vsel %vm674_vm1, %v732_v13, 0.0  ;;  %v735_v22 = vld [vmem:[#allocation2 + $0xe0] sm:$0xff] }
 0x13a   : > { %v757_v28 = vadd.f32 %v756_v23, %v755_v20  ;;  %v1162_v29 = vpop.f32.mrf.mxu0  ;;  %v721_v44 = vld [vmem:[#allocation2 + $0x70] sm:$0xff]  ;;  %v790_v21 = vsel %vm674_vm1, %v733_v16, 0.0 }
 0x13b   : > { %693 = vst.msk [vmem:[#allocation2 + $0x90] sm:$0xff] %vm674_vm1, %v660_v24  ;;  %v658_v33 = vmax.f32 %v580_v26, 0.0  ;;  %v591_v34 = vadd.f32 %v1162_v29, %v1597_v32  ;;  %v766_v50 = vsel %vm674_vm1, %v721_v44, 0.0  ;;  %v792_v24 = vsel %vm674_vm1, %v734_v19, 0.0  ;;  %v736_v26 = vld [vmem:[#allocation2 + $0xe8] sm:$0xff]  ;;  %v737_v29 = vld [vmem:[#allocation2 + $0xf0] sm:$0xff] }
 0x13c   : > { %v759_v35 = vadd.f32 %v758_v30, %v757_v28  ;;  %v719_v36 = vld [vmem:[#allocation2 + $0x60] sm:$0xff]  ;;  %v582_v37 = vpop.f32.mrf.mxu0  ;;  %v794_v28 = vsel %vm674_vm1, %v735_v22, 0.0 }
 0x13d   : > { %691 = vst.msk [vmem:[#allocation2 + $0x80] sm:$0xff] %vm674_vm1, %v658_v33  ;;  %v661_v39 = vmax.f32 %v591_v34, 0.0  ;;  %v583_v40 = vadd.f32 %v582_v37, %v1597_v32  ;;  %v762_v42 = vsel %vm674_vm1, %v719_v36, 0.0  ;;  %v796_v33 = vsel %vm674_vm1, %v736_v26, 0.0  ;;  %v738_v34 = vld [vmem:[#allocation2 + $0xf8] sm:$0xff] }
 0x13e   : > { %v761_v41 = vadd.f32 %v760_v38, %v759_v35  ;;  %v722_v48 = vld [vmem:[#allocation2 + $0x78] sm:$0xff]  ;;  %v798_v36 = vsel %vm674_vm1, %v737_v29, 0.0  ;;  %v800_v38 = vsel %vm674_vm1, %v738_v34, 0.0 }
 0x13f   : > { %694 = vst.msk [vmem:[#allocation2 + $0x98] sm:$0xff] %vm674_vm1, %v661_v39  ;;  %v659_v43 = vmax.f32 %v583_v40, 0.0  ;;  %v768_v32 = vsel %vm674_vm1, %v722_v48, 0.0  ;;  %v1285_v48 = vld [vmem:[%s1759_s3 + $0x8] sm:$0xff]  }
 0x140   : > { %v763_v45 = vadd.f32 %v762_v42, %v761_v41  ;;  %v720_v46 = vld [vmem:[#allocation2 + $0x68] sm:$0xff] }
 0x141   : > { %v764_v47 = vsel %vm674_vm1, %v720_v46, 0.0  ;;  %692 = vst.msk [vmem:[#allocation2 + $0x88] sm:$0xff] %vm674_vm1, %v659_v43 }
 0x142   : > { %v765_v49 = vadd.f32 %v764_v47, %v763_v45  ;;  %v725_v55 = vld [vmem:[#allocation2 + $0x90] sm:$0xff] }
 0x143   : > { %v774_v61 = vsel %vm674_vm1, %v725_v55, 0.0 }
 0x144   : > { %v767_v51 = vadd.f32 %v766_v50, %v765_v49  ;;  %v723_v52 = vld [vmem:[#allocation2 + $0x80] sm:$0xff]  ;;  %v828_v49 = vrot.slane %v1594_v31, 1 }
 0x145   : > { %v770_v54 = vsel %vm674_vm1, %v723_v52, 0.0 }
 0x146   : > { %v769_v53 = vadd.f32 %v768_v32, %v767_v51  ;;  %v726_v59 = vld [vmem:[#allocation2 + $0x98] sm:$0xff] }
 0x147   : > { %v776_v0 = vsel %vm674_vm1, %v726_v59, 0.0 }
 0x148   : > { %v771_v56 = vadd.f32 %v770_v54, %v769_v53  ;;  %v724_v57 = vld [vmem:[#allocation2 + $0x88] sm:$0xff] }
 0x149   : > { %v772_v58 = vsel %vm674_vm1, %v724_v57, 0.0 }
 0x14a   : > { %v773_v60 = vadd.f32 %v772_v58, %v771_v56 }
 0x14c   : > { %v775_v63 = vadd.f32 %v774_v61, %v773_v60  ;;  %v1286_v60 = vld [vmem:[%s1759_s3] sm:$0xff]  }
 0x14e   : > { %v777_v2 = vadd.f32 %v776_v0, %v775_v63 }
 0x150   : > { %v779_v5 = vadd.f32 %v778_v3, %v777_v2  ;;  %v895_v2 = vpop.permute.xlu0 %894 }
 0x152   : > { %v781_v8 = vadd.f32 %v780_v6, %v779_v5 }
 0x154   : > { %v783_v10 = vadd.f32 %v782_v9, %v781_v8  ;;  %v920_v9 = vrot.slane %v1594_v31, 2 }
 0x156   : > { %v785_v14 = vadd.f32 %v784_v12, %v783_v10 }
 0x158   : > { %v787_v17 = vadd.f32 %v786_v15, %v785_v14 }
 0x15a   : > { %v789_v20 = vadd.f32 %v788_v18, %v787_v17 }
 0x15c   : > { %v791_v23 = vadd.f32 %v790_v21, %v789_v20 }
 0x15e   : > { %v793_v27 = vadd.f32 %v792_v24, %v791_v23 }
 0x160   : > { %v795_v30 = vadd.f32 %v794_v28, %v793_v27 }
 0x162   : > { %v797_v35 = vadd.f32 %v796_v33, %v795_v30 }
 0x164   : > { %v799_v37 = vadd.f32 %v798_v36, %v797_v35 }
 0x166   : > { %v801_v39 = vadd.f32 %v800_v38, %v799_v37 }
 0x168   : > { %v802_v40 = vrot.slane %v801_v39, 4 }
 0x16a   : > { %v803_v41 = vadd.f32 %v802_v40, %v801_v39 }
 0x16c   : > { %v804_v42 = vrot.slane %v803_v41, 2 }
 0x16e   : > { %v805_v43 = vadd.f32 %v804_v42, %v803_v41 }
 0x170   : > { %v806_v44 = vrot.slane %v805_v43, 1 }
 0x172   : > { %v807_v45 = vadd.f32 %v806_v44, %v805_v43 }
 0x174   : > { %v809_v46 = vmul.f32 0.00390625, %v807_v45 }
 0x176   : > { %v810_v47 = vpack.c.bf16 %v809_v46, %v809_v46 }
 0x178   : > { %1180 = vmatmul.mubr.msk.bf16.vlgmr.msra.gmra.mxu1 %vm674_vm1, %v810_v47 }
 0x179   : > { %1187 = vmatprep.mubr.msk.bf16.mxu1 %vm1389_vm0, %v1388_v25  ;;  %1184 = vmatpush3.bf16.msra.mxu1 %v1285_v48 }
 0x17a   : > { %1185 = vmatprep.subr.bf16.mxu1 %v1388_v25 }
 0x17d   : > { %1186 = vmatpush3.bf16.msra.mxu1 %v1286_v60 }
 0x238   : > { %v867_v50 = vpop.f32.mrf.mxu1 }
 0x239   : > { %v868_v51 = vadd.f32 %v867_v50, %v828_v49 }
 0x23a   : > { %v1181_v52 = vpop.f32.mrf.mxu1 }
 0x23b   : > { %v874_v32 = vand.u32 2147483647, %v868_v51  ;;  %v873_v1 = vmax.f32 %v868_v51, 0.0 }
 0x23c   : > { %v870_v53 = vpop.f32.mrf.mxu1 }
 0x23d   : > { %v875_v54 = vsub.f32 0.0, %v874_v32 }
 0x23e   : > { %v1182_v55 = vpop.f32.mrf.mxu1 }
 0x23f   : > { %v876_v56 = vmul.f32 1.442695, %v875_v54 }
 0x241   : > { %1287 = vpow2.f32 %v876_v56 }
 0x24e   : > { %v1288_v57 = vpop.eup %1287 }
 0x24f   : > { %v878_v58 = vadd.f32 1.0, %v1288_v57  ;;  %v881_v59 = vmul.f32 -0.5, %v1288_v57  ;;  %v884_v61 = vand.u32 2147483647, %v1288_v57 }
 0x251   : > { %1289 = vlog2.f32 %v878_v58  ;;  %v882_v25 = vadd.f32 1.0, %v881_v59  ;;  %vm885_vm2 = vcmp.lt.f32.partialorder %v884_v61, 0.0004427343 }
 0x253   : > { %v883_v0 = vmul.f32 %v1288_v57, %v882_v25 }
 0x25e   : > { %v1290_v62 = vpop.eup %1289 }
 0x25f   : > { %v880_v63 = vmul.f32 0.6931472, %v1290_v62 }
 0x261   : > { %v886_v3 = vsel %vm885_vm2, %v883_v0, %v880_v63 }
 0x262   : > { %v887_v4 = vadd.f32 %v886_v3, %v873_v1 }
 0x264   : > { %v897_v5 = vmul.f32 %v895_v2, %v887_v4 }
 0x266   : > { %899 = vrot.lane.b32.xlu0 %v897_v5, %s1391_s11 }
 0x2d8   : > { %v900_v6 = vpop.permute.xlu0 %899 }
 0x2d9   : > { %v902_v7 = vadd.f32 %v900_v6, %v868_v51 }
 0x2db   : > { %v903_v8 = vpack.c.bf16 %v902_v7, %v902_v7 }
 0x2dd   : > { %1188 = vmatmul.mubr.msk.bf16.vlgmr.msra.gmra.mxu1 %vm674_vm1, %v903_v8 }
 0x39d   : > { %v959_v10 = vpop.f32.mrf.mxu1 }
 0x39e   : > { %v960_v11 = vadd.f32 %v959_v10, %v920_v9 }
 0x39f   : > { %v1189_v12 = vpop.f32.mrf.mxu1 }
 0x3a0   : > { %965 = vst [vmem:[%s279_s8] sm:$0x1] %v960_v11 }
 0x3a1   : > { %v962_v13 = vpop.f32.mrf.mxu1 }
 0x3a2   : > { %1332 = shalt.err (!%p1329_p0)
}
 0x3a3   : > { %s1333_s18 = scalar_lea.hbm %s1713_s26, 16  ;;  %s1337_s20 = scalar_lea.hbm %s1762_s6, 32 }
 0x3a4   : > { %p1334_p2 = scmp.ne.s32.totalorder %s1713_s26, %s1333_s18  ;;  %p1338_p3 = scmp.lt.s32.totalorder %s1713_s26, %s1762_s6 }
 0x3a5   : > { %p1339_p6 = scmp.lt.s32.totalorder %s1337_s20, %s1333_s18 }
 0x3a6   : > { %p1335_p9 = pnand %p1334_p2, %p1771_p13 }
 0x3a7   : > { %p1340_p11 = por %p1339_p6, %p1338_p3 }
 0x3a8   : > { %p1336_p1 = pneg %p1335_p9 }
 0x3aa   : > { %p1341_p12 = pnand %p1340_p11, %p1336_p1 }
 0x3ac   : > { %1344 = shalt.err (!%p1341_p12)
}
 0x3ad   : > { %1209 = dma.vmem_to_hbm [thread:$0]  (%p1771_p13), %s1715_s13, 16, %s1713_s26, %s967_s28   ;;  %v1190_v31 = vpop.f32.mrf.mxu1 }
 0x3ae PF: > { %s991_s8 = sand.u32 1, %s1371_s21   ;;  %p1772_p4 = scmp.ne.s32.totalorder %s1768_s10, 0 }
 0x3af   : > { %p1773_p5 = scmp.ge.s32.totalorder %s1383_s24, 2  ;;  %s992_s15 = scalar_lea.sflag [#allocation5], %s991_s8 }
 0x3b1   : > { %p1216_p7 = pnand %p1773_p5, %p1772_p4 }
 0x3b3   : > { %p1217_p8 = pneg %p1216_p7 }
 0x3b5   : > { %1366 = dma.done.wait (%p1217_p8), %s992_s15, 16  }
 0x3b6   : > { %1368 = vsyncadd (%p1217_p8), %s992_s15, 4294967280  ;;  %p19_p10 = scmp.ge.s32.totalorder %s1453_s27, 4   ;;  %s1774_s21 = smov %s1375_s22 }
 0x3b7   : > { %s1775_s22 = smov %s1379_s23  ;;  %s1776_s23 = smov %s1465_s30 }
 0x3b8   : > { %s1777_s24 = smov %s1453_s27  ;;  %21 = sbr.rel (!%p19_p10) target bundleno = 5 (0x5), region = 92 }
 0x3bd   :  { %996 = vsyncpa [#allocation4], 1 }
 0x3be   :  { %998 = vsyncpa [#allocation4 + $0x1], 1 }
 0x3bf   :  { %999 = vsyncpa [#allocation5], 1 }
 0x3c0   :  { %1001 = vsyncpa [#allocation5 + $0x1], 1 }

</bundles_post_ra>
